<compile_context>
chip_gen: v5e
topology: v5e:2x2
jax: 0.10.0
libtpu: 0.0.40
codegen_flags: <defaults>
</compile_context>

<pallas_src>
import math

import jax
import jax.numpy as jnp
from jax.experimental import pallas as pl
from jax.experimental.pallas import tpu as pltpu  # noqa: F401

# ---- model hyper-parameters (small, consistent with the module) ----
B = 2          # batch
S = 8          # sequence length
D = 32         # model_dimension
NH = 4         # number of attention heads
HD = D // NH   # head dimension
FF = 4 * D     # pointwise-net hidden width
LN_EPS = 1e-5  # torch.nn.LayerNorm default


def _layer_norm(v, gamma, beta):
    mu = jnp.mean(v, axis=-1, keepdims=True)
    var = jnp.mean((v - mu) ** 2, axis=-1, keepdims=True)
    return (v - mu) * jax.lax.rsqrt(var + LN_EPS) * gamma + beta


def encoder_layer_kernel(x_ref, mask_ref, vec_ref, w_attn_ref, w_ffn_ref, out_ref):
    x = x_ref[...]            # (B*S, D)
    vec = vec_ref[...]        # (8, 128) packed small params (one vreg tile)
    madd = mask_ref[...]      # (B, S) additive key mask: 0 keep / -1e30 drop

    # static slices of the packed parameter slab
    ln1_g = vec[0:1, :D]
    ln1_b = vec[1:2, :D]
    b_qkv = vec[2:3, :3 * D]
    bo    = vec[3:4, :D]
    ln2_g = vec[4:5, :D]
    ln2_b = vec[5:6, :D]
    b1    = vec[6:7, :FF]
    b2    = vec[7:8, :D]

    # ---- sublayer 0: pre-norm multi-headed self-attention ----
    xn = _layer_norm(x, ln1_g, ln1_b)                                   # (BS, D)

    # fused QKV projection: one 2D MXU matmul (K=32, N=96)
    qkv = jnp.dot(xn, w_attn_ref[:, :3 * D],
                  preferred_element_type=jnp.float32) + b_qkv           # (BS, 3D)

    scale = 1.0 / math.sqrt(HD)

    # per-batch (no cross-batch score waste), per-head attention via static
    # lane/sublane slices; B*NH = 8 tiny matmul pairs, all trace-time unrolled.
    batch_rows = []
    for b in range(B):
        r0 = b * S
        m_b = madd[b:b + 1, :]                                          # (1, S)
        head_outs = []
        for h in range(NH):
            c = h * HD
            q = qkv[r0:r0 + S, c:c + HD] * scale                        # (S, HD)
            k = qkv[r0:r0 + S, D + c:D + c + HD]                        # (S, HD)
            v = qkv[r0:r0 + S, 2 * D + c:2 * D + c + HD]                # (S, HD)

            s = jnp.dot(q, k.T, preferred_element_type=jnp.float32)     # (S, S)
            s = s + m_b                                                 # additive mask
            s = s - jnp.max(s, axis=-1, keepdims=True)
            p = jnp.exp(s)
            p = p * pl.reciprocal(jnp.sum(p, axis=-1, keepdims=True),
                                  approx=True)                          # EUP vrcp
            head_outs.append(jnp.dot(p, v,
                                     preferred_element_type=jnp.float32))  # (S, HD)
        batch_rows.append(jnp.concatenate(head_outs, axis=-1))          # (S, D)
    attn2d = jnp.concatenate(batch_rows, axis=0)                        # (BS, D)

    # fused output projection: one (BS, D) @ (D, D) matmul
    attn = jnp.dot(attn2d, w_attn_ref[:, 3 * D:4 * D],
                   preferred_element_type=jnp.float32) + bo
    y1 = x + attn   # dropout == identity (eval mode)

    # ---- sublayer 1: pre-norm pointwise feed-forward net ----
    yn = _layer_norm(y1, ln2_g, ln2_b)
    h1 = jnp.dot(yn, w_ffn_ref[0:D, :],
                 preferred_element_type=jnp.float32) + b1               # (BS, FF)
    h1 = jnp.maximum(h1, 0.0)                                           # ReLU
    ffn = jnp.dot(h1, w_ffn_ref[D:D + FF, 0:D],
                  preferred_element_type=jnp.float32) + b2              # (BS, D)

    out_ref[...] = y1 + ffn


def encoder_layer(x, mask, params):
    """x: (B,S,D) f32, mask: (B,1,S) f32 {0,1}, params: list of arrays."""
    (ln1_g, ln1_b, wq, bq, wk, bk, wv, bv, wo, bo,
     ln2_g, ln2_b, w1, b1, w2, b2) = params
    Bn, Sn, Dn = x.shape
    BS = Bn * Sn

    # ---- wrapper-side layout plumbing (free XLA ops) ----
    def row(v, width=128):                     # pad a 1-row param to 128 lanes
        v = v.reshape(1, -1)
        return jnp.pad(v, ((0, 0), (0, width - v.shape[1])))

    b_qkv = jnp.concatenate(
        [bq.reshape(1, -1), bk.reshape(1, -1), bv.reshape(1, -1)], axis=-1)  # (1,3D)

    # one (8,128) slab: exactly one vreg tile, one DMA
    vec_slab = jnp.concatenate(
        [row(ln1_g), row(ln1_b), row(b_qkv), row(bo),
         row(ln2_g), row(ln2_b), row(b1), row(b2)], axis=0)                  # (8,128)

    # attention weights slab: [Wq | Wk | Wv | Wo] -> (D, 4D) = (32, 128)
    w_attn = jnp.concatenate([wq, wk, wv, wo], axis=-1)

    # FFN weights slab: W1 (D,FF) on top, W2 (FF,D) zero-padded to 128 lanes
    w2_pad = jnp.pad(w2, ((0, 0), (0, w1.shape[1] - w2.shape[1])))           # (FF,128)
    w_ffn = jnp.concatenate([w1, w2_pad], axis=0)                            # (D+FF,128)

    # additive key-padding mask per batch: 0 keep / -1e30 drop  (B, S)
    mask_add = jnp.where(mask.reshape(Bn, Sn) > 0, 0.0, -1e30).astype(jnp.float32)

    x2d = x.reshape(BS, Dn)   # one slab, lane axis = D

    # gridless single invocation (whole problem < one vreg pair); when B*S is
    # scaled up, switch to grid=(B,) + dimension_semantics=("parallel",).
    out2d = pl.pallas_call(
        encoder_layer_kernel,
        out_shape=jax.ShapeDtypeStruct((BS, Dn), jnp.float32),
    )(x2d, mask_add, vec_slab, w_attn, w_ffn)

    return out2d.reshape(Bn, Sn, Dn)


# ---------------- pure-JAX reference (for correctness check) ----------------
def reference(x, mask, params):
    (ln1_g, ln1_b, wq, bq, wk, bk, wv, bv, wo, bo,
     ln2_g, ln2_b, w1, b1, w2, b2) = params
    xn = _layer_norm(x, ln1_g, ln1_b)
    q = xn @ wq + bq
    k = xn @ wk + bk
    v = xn @ wv + bv

    def split(t):  # (B,S,D) -> (B,NH,S,HD)
        return t.reshape(B, S, NH, HD).transpose(0, 2, 1, 3)

    qh, kh, vh = split(q), split(k), split(v)
    scores = jnp.einsum("bhqd,bhkd->bhqk", qh, kh) / math.sqrt(HD)
    scores = jnp.where(mask[:, None, :, :] > 0, scores, -1e30)
    p = jax.nn.softmax(scores, axis=-1)
    attn = jnp.einsum("bhqk,bhkd->bhqd", p, vh)
    attn = attn.transpose(0, 2, 1, 3).reshape(B, S, D) @ wo + bo
    y1 = x + attn
    yn = _layer_norm(y1, ln2_g, ln2_b)
    ffn = jnp.maximum(yn @ w1 + b1, 0.0) @ w2 + b2
    return y1 + ffn


if __name__ == "__main__":
    key = jax.random.PRNGKey(0)
    ks = jax.random.split(key, 12)

    x = jax.random.normal(ks[0], (B, S, D), jnp.float32)

    # padding mask: batch 0 fully visible, batch 1 has last 2 keys masked
    mask = jnp.ones((B, 1, S), jnp.float32)
    mask = mask.at[1, 0, S - 2:].set(0.0)

    scale = 0.1
    params = [
        jnp.ones((1, D), jnp.float32),                                   # ln1 gamma
        jnp.zeros((1, D), jnp.float32),                                  # ln1 beta
        scale * jax.random.normal(ks[1], (D, D), jnp.float32),           # Wq
        scale * jax.random.normal(ks[2], (1, D), jnp.float32),           # bq
        scale * jax.random.normal(ks[3], (D, D), jnp.float32),           # Wk
        scale * jax.random.normal(ks[4], (1, D), jnp.float32),           # bk
        scale * jax.random.normal(ks[5], (D, D), jnp.float32),           # Wv
        scale * jax.random.normal(ks[6], (1, D), jnp.float32),           # bv
        scale * jax.random.normal(ks[7], (D, D), jnp.float32),           # Wo
        scale * jax.random.normal(ks[8], (1, D), jnp.float32),           # bo
        jnp.ones((1, D), jnp.float32),                                   # ln2 gamma
        jnp.zeros((1, D), jnp.float32),                                  # ln2 beta
        scale * jax.random.normal(ks[9], (D, FF), jnp.float32),          # W1
        scale * jax.random.normal(ks[10], (1, FF), jnp.float32),         # b1
        scale * jax.random.normal(ks[11], (FF, D), jnp.float32),         # W2
        jnp.zeros((1, D), jnp.float32),                                  # b2
    ]

    out = encoder_layer(x, mask, params)
    out = jax.block_until_ready(out)

    ref = reference(x, mask, params)
    assert out.shape == (B, S, D)
    # tolerance 1e-3: pl.reciprocal(approx=True) in the softmax denominator is
    # the only approximation vs the exact reference.
    assert jnp.allclose(out, ref, rtol=1e-3, atol=1e-3), (
        f"max abs err {jnp.max(jnp.abs(out - ref))}")

    # TODO(synk): dropout is a no-op here (eval mode); training-mode dropout
    # would use pltpu.prng_seed + pltpu.stateful_bernoulli.
    print("KERNEL_OK")
</pallas_src>

<mosaic_0001>
module attributes {stable_mosaic.version = 11 : i64} {
  func.func @encoder_layer_kernel(%arg0: memref<16x32xf32, #tpu.memory_space<vmem>>, %arg1: memref<2x8xf32, #tpu.memory_space<vmem>>, %arg2: memref<8x128xf32, #tpu.memory_space<vmem>>, %arg3: memref<32x128xf32, #tpu.memory_space<vmem>>, %arg4: memref<160x128xf32, #tpu.memory_space<vmem>>, %arg5: memref<16x32xf32, #tpu.memory_space<vmem>>) attributes {dimension_semantics = [], scalar_prefetch = 0 : i64, scratch_operands = 0 : i64, tpu.core_type = #tpu.core_type<tc>} {
    %c0 = arith.constant 0 : index
    %c0_0 = arith.constant 0 : index
    %0 = vector.load %arg0[%c0, %c0_0] : memref<16x32xf32, #tpu.memory_space<vmem>>, vector<16x32xf32>
    %c0_1 = arith.constant 0 : index
    %c0_2 = arith.constant 0 : index
    %1 = vector.load %arg2[%c0_1, %c0_2] : memref<8x128xf32, #tpu.memory_space<vmem>>, vector<8x128xf32>
    %c0_3 = arith.constant 0 : index
    %c0_4 = arith.constant 0 : index
    %2 = vector.load %arg1[%c0_3, %c0_4] : memref<2x8xf32, #tpu.memory_space<vmem>>, vector<2x8xf32>
    %3 = vector.extract_strided_slice %1 {offsets = [0, 0], sizes = [1, 32], strides = [1, 1]} : vector<8x128xf32> to vector<1x32xf32>
    %4 = vector.extract_strided_slice %1 {offsets = [1, 0], sizes = [1, 32], strides = [1, 1]} : vector<8x128xf32> to vector<1x32xf32>
    %5 = vector.extract_strided_slice %1 {offsets = [2, 0], sizes = [1, 96], strides = [1, 1]} : vector<8x128xf32> to vector<1x96xf32>
    %6 = vector.extract_strided_slice %1 {offsets = [3, 0], sizes = [1, 32], strides = [1, 1]} : vector<8x128xf32> to vector<1x32xf32>
    %7 = vector.extract_strided_slice %1 {offsets = [4, 0], sizes = [1, 32], strides = [1, 1]} : vector<8x128xf32> to vector<1x32xf32>
    %8 = vector.extract_strided_slice %1 {offsets = [5, 0], sizes = [1, 32], strides = [1, 1]} : vector<8x128xf32> to vector<1x32xf32>
    %9 = vector.extract_strided_slice %1 {offsets = [6, 0], sizes = [1, 128], strides = [1, 1]} : vector<8x128xf32> to vector<1x128xf32>
    %10 = vector.extract_strided_slice %1 {offsets = [7, 0], sizes = [1, 32], strides = [1, 1]} : vector<8x128xf32> to vector<1x32xf32>
    %cst = arith.constant dense<0.000000e+00> : vector<16xf32>
    %11 = vector.multi_reduction <add>, %0, %cst [1] : vector<16x32xf32> to vector<16xf32>
    %12 = vector.shape_cast %11 : vector<16xf32> to vector<16x1xf32>
    %cst_5 = arith.constant 3.200000e+01 : f32
    %13 = vector.broadcast %cst_5 : f32 to vector<16x1xf32>
    %14 = arith.divf %12, %13 : vector<16x1xf32>
    %15 = vector.broadcast %14 : vector<16x1xf32> to vector<16x32xf32>
    %16 = arith.subf %0, %15 : vector<16x32xf32>
    %17 = arith.mulf %16, %16 : vector<16x32xf32>
    %cst_6 = arith.constant dense<0.000000e+00> : vector<16xf32>
    %18 = vector.multi_reduction <add>, %17, %cst_6 [1] : vector<16x32xf32> to vector<16xf32>
    %19 = vector.shape_cast %18 : vector<16xf32> to vector<16x1xf32>
    %cst_7 = arith.constant 3.200000e+01 : f32
    %20 = vector.broadcast %cst_7 : f32 to vector<16x1xf32>
    %21 = arith.divf %19, %20 : vector<16x1xf32>
    %22 = vector.broadcast %14 : vector<16x1xf32> to vector<16x32xf32>
    %23 = arith.subf %0, %22 : vector<16x32xf32>
    %cst_8 = arith.constant 9.99999974E-6 : f32
    %24 = vector.broadcast %cst_8 : f32 to vector<16x1xf32>
    %25 = arith.addf %21, %24 : vector<16x1xf32>
    %26 = math.rsqrt %25 : vector<16x1xf32>
    %27 = vector.broadcast %26 : vector<16x1xf32> to vector<16x32xf32>
    %28 = arith.mulf %23, %27 : vector<16x32xf32>
    %29 = vector.broadcast %3 : vector<1x32xf32> to vector<16x32xf32>
    %30 = arith.mulf %28, %29 : vector<16x32xf32>
    %31 = vector.broadcast %4 : vector<1x32xf32> to vector<16x32xf32>
    %32 = arith.addf %30, %31 : vector<16x32xf32>
    %c0_9 = arith.constant 0 : index
    %c0_10 = arith.constant 0 : index
    %33 = vector.load %arg3[%c0_9, %c0_10] : memref<32x128xf32, #tpu.memory_space<vmem>>, vector<32x96xf32>
    %cst_11 = arith.constant dense<0.000000e+00> : vector<16x96xf32>
    %34 = tpu.matmul %32, %33, %cst_11 {dimension_numbers = #tpu.dot_dimension_numbers<[1], [0], [0], [1], [0, 0, 1, 1], [], []>} : vector<16x32xf32>, vector<32x96xf32>, vector<16x96xf32> -> vector<16x96xf32>
    %35 = vector.broadcast %5 : vector<1x96xf32> to vector<16x96xf32>
    %36 = arith.addf %34, %35 : vector<16x96xf32>
    %37 = vector.extract_strided_slice %2 {offsets = [0, 0], sizes = [1, 8], strides = [1, 1]} : vector<2x8xf32> to vector<1x8xf32>
    %38 = vector.extract_strided_slice %36 {offsets = [0, 0], sizes = [8, 8], strides = [1, 1]} : vector<16x96xf32> to vector<8x8xf32>
    %cst_12 = arith.constant 0.353553385 : f32
    %39 = vector.broadcast %cst_12 : f32 to vector<8x8xf32>
    %40 = arith.mulf %38, %39 : vector<8x8xf32>
    %41 = vector.extract_strided_slice %36 {offsets = [0, 32], sizes = [8, 8], strides = [1, 1]} : vector<16x96xf32> to vector<8x8xf32>
    %42 = vector.extract_strided_slice %36 {offsets = [0, 64], sizes = [8, 8], strides = [1, 1]} : vector<16x96xf32> to vector<8x8xf32>
    %43 = tpu.transpose %41, [1, 0] : vector<8x8xf32> -> vector<8x8xf32>
    %cst_13 = arith.constant dense<0.000000e+00> : vector<8x8xf32>
    %44 = tpu.matmul %40, %43, %cst_13 {dimension_numbers = #tpu.dot_dimension_numbers<[1], [0], [0], [1], [0, 0, 1, 1], [], []>} : vector<8x8xf32>, vector<8x8xf32>, vector<8x8xf32> -> vector<8x8xf32>
    %45 = vector.broadcast %37 : vector<1x8xf32> to vector<8x8xf32>
    %46 = arith.addf %44, %45 : vector<8x8xf32>
    %cst_14 = arith.constant dense<0xFF800000> : vector<8xf32>
    %47 = vector.multi_reduction <maximumf>, %46, %cst_14 [1] : vector<8x8xf32> to vector<8xf32>
    %48 = vector.shape_cast %47 : vector<8xf32> to vector<8x1xf32>
    %49 = vector.broadcast %48 : vector<8x1xf32> to vector<8x8xf32>
    %50 = arith.subf %46, %49 : vector<8x8xf32>
    %51 = math.exp %50 : vector<8x8xf32>
    %cst_15 = arith.constant dense<0.000000e+00> : vector<8xf32>
    %52 = vector.multi_reduction <add>, %51, %cst_15 [1] : vector<8x8xf32> to vector<8xf32>
    %53 = vector.shape_cast %52 : vector<8xf32> to vector<8x1xf32>
    %54 = tpu.reciprocal %53 {approx = true} : vector<8x1xf32> -> vector<8x1xf32>
    %55 = vector.broadcast %54 : vector<8x1xf32> to vector<8x8xf32>
    %56 = arith.mulf %51, %55 : vector<8x8xf32>
    %cst_16 = arith.constant dense<0.000000e+00> : vector<8x8xf32>
    %57 = tpu.matmul %56, %42, %cst_16 {dimension_numbers = #tpu.dot_dimension_numbers<[1], [0], [0], [1], [0, 0, 1, 1], [], []>} : vector<8x8xf32>, vector<8x8xf32>, vector<8x8xf32> -> vector<8x8xf32>
    %58 = vector.extract_strided_slice %36 {offsets = [0, 8], sizes = [8, 8], strides = [1, 1]} : vector<16x96xf32> to vector<8x8xf32>
    %cst_17 = arith.constant 0.353553385 : f32
    %59 = vector.broadcast %cst_17 : f32 to vector<8x8xf32>
    %60 = arith.mulf %58, %59 : vector<8x8xf32>
    %61 = vector.extract_strided_slice %36 {offsets = [0, 40], sizes = [8, 8], strides = [1, 1]} : vector<16x96xf32> to vector<8x8xf32>
    %62 = vector.extract_strided_slice %36 {offsets = [0, 72], sizes = [8, 8], strides = [1, 1]} : vector<16x96xf32> to vector<8x8xf32>
    %63 = tpu.transpose %61, [1, 0] : vector<8x8xf32> -> vector<8x8xf32>
    %cst_18 = arith.constant dense<0.000000e+00> : vector<8x8xf32>
    %64 = tpu.matmul %60, %63, %cst_18 {dimension_numbers = #tpu.dot_dimension_numbers<[1], [0], [0], [1], [0, 0, 1, 1], [], []>} : vector<8x8xf32>, vector<8x8xf32>, vector<8x8xf32> -> vector<8x8xf32>
    %65 = vector.broadcast %37 : vector<1x8xf32> to vector<8x8xf32>
    %66 = arith.addf %64, %65 : vector<8x8xf32>
    %cst_19 = arith.constant dense<0xFF800000> : vector<8xf32>
    %67 = vector.multi_reduction <maximumf>, %66, %cst_19 [1] : vector<8x8xf32> to vector<8xf32>
    %68 = vector.shape_cast %67 : vector<8xf32> to vector<8x1xf32>
    %69 = vector.broadcast %68 : vector<8x1xf32> to vector<8x8xf32>
    %70 = arith.subf %66, %69 : vector<8x8xf32>
    %71 = math.exp %70 : vector<8x8xf32>
    %cst_20 = arith.constant dense<0.000000e+00> : vector<8xf32>
    %72 = vector.multi_reduction <add>, %71, %cst_20 [1] : vector<8x8xf32> to vector<8xf32>
    %73 = vector.shape_cast %72 : vector<8xf32> to vector<8x1xf32>
    %74 = tpu.reciprocal %73 {approx = true} : vector<8x1xf32> -> vector<8x1xf32>
    %75 = vector.broadcast %74 : vector<8x1xf32> to vector<8x8xf32>
    %76 = arith.mulf %71, %75 : vector<8x8xf32>
    %cst_21 = arith.constant dense<0.000000e+00> : vector<8x8xf32>
    %77 = tpu.matmul %76, %62, %cst_21 {dimension_numbers = #tpu.dot_dimension_numbers<[1], [0], [0], [1], [0, 0, 1, 1], [], []>} : vector<8x8xf32>, vector<8x8xf32>, vector<8x8xf32> -> vector<8x8xf32>
    %78 = vector.extract_strided_slice %36 {offsets = [0, 16], sizes = [8, 8], strides = [1, 1]} : vector<16x96xf32> to vector<8x8xf32>
    %cst_22 = arith.constant 0.353553385 : f32
    %79 = vector.broadcast %cst_22 : f32 to vector<8x8xf32>
    %80 = arith.mulf %78, %79 : vector<8x8xf32>
    %81 = vector.extract_strided_slice %36 {offsets = [0, 48], sizes = [8, 8], strides = [1, 1]} : vector<16x96xf32> to vector<8x8xf32>
    %82 = vector.extract_strided_slice %36 {offsets = [0, 80], sizes = [8, 8], strides = [1, 1]} : vector<16x96xf32> to vector<8x8xf32>
    %83 = tpu.transpose %81, [1, 0] : vector<8x8xf32> -> vector<8x8xf32>
    %cst_23 = arith.constant dense<0.000000e+00> : vector<8x8xf32>
    %84 = tpu.matmul %80, %83, %cst_23 {dimension_numbers = #tpu.dot_dimension_numbers<[1], [0], [0], [1], [0, 0, 1, 1], [], []>} : vector<8x8xf32>, vector<8x8xf32>, vector<8x8xf32> -> vector<8x8xf32>
    %85 = vector.broadcast %37 : vector<1x8xf32> to vector<8x8xf32>
    %86 = arith.addf %84, %85 : vector<8x8xf32>
    %cst_24 = arith.constant dense<0xFF800000> : vector<8xf32>
    %87 = vector.multi_reduction <maximumf>, %86, %cst_24 [1] : vector<8x8xf32> to vector<8xf32>
    %88 = vector.shape_cast %87 : vector<8xf32> to vector<8x1xf32>
    %89 = vector.broadcast %88 : vector<8x1xf32> to vector<8x8xf32>
    %90 = arith.subf %86, %89 : vector<8x8xf32>
    %91 = math.exp %90 : vector<8x8xf32>
    %cst_25 = arith.constant dense<0.000000e+00> : vector<8xf32>
    %92 = vector.multi_reduction <add>, %91, %cst_25 [1] : vector<8x8xf32> to vector<8xf32>
    %93 = vector.shape_cast %92 : vector<8xf32> to vector<8x1xf32>
    %94 = tpu.reciprocal %93 {approx = true} : vector<8x1xf32> -> vector<8x1xf32>
    %95 = vector.broadcast %94 : vector<8x1xf32> to vector<8x8xf32>
    %96 = arith.mulf %91, %95 : vector<8x8xf32>
    %cst_26 = arith.constant dense<0.000000e+00> : vector<8x8xf32>
    %97 = tpu.matmul %96, %82, %cst_26 {dimension_numbers = #tpu.dot_dimension_numbers<[1], [0], [0], [1], [0, 0, 1, 1], [], []>} : vector<8x8xf32>, vector<8x8xf32>, vector<8x8xf32> -> vector<8x8xf32>
    %98 = vector.extract_strided_slice %36 {offsets = [0, 24], sizes = [8, 8], strides = [1, 1]} : vector<16x96xf32> to vector<8x8xf32>
    %cst_27 = arith.constant 0.353553385 : f32
    %99 = vector.broadcast %cst_27 : f32 to vector<8x8xf32>
    %100 = arith.mulf %98, %99 : vector<8x8xf32>
    %101 = vector.extract_strided_slice %36 {offsets = [0, 56], sizes = [8, 8], strides = [1, 1]} : vector<16x96xf32> to vector<8x8xf32>
    %102 = vector.extract_strided_slice %36 {offsets = [0, 88], sizes = [8, 8], strides = [1, 1]} : vector<16x96xf32> to vector<8x8xf32>
    %103 = tpu.transpose %101, [1, 0] : vector<8x8xf32> -> vector<8x8xf32>
    %cst_28 = arith.constant dense<0.000000e+00> : vector<8x8xf32>
    %104 = tpu.matmul %100, %103, %cst_28 {dimension_numbers = #tpu.dot_dimension_numbers<[1], [0], [0], [1], [0, 0, 1, 1], [], []>} : vector<8x8xf32>, vector<8x8xf32>, vector<8x8xf32> -> vector<8x8xf32>
    %105 = vector.broadcast %37 : vector<1x8xf32> to vector<8x8xf32>
    %106 = arith.addf %104, %105 : vector<8x8xf32>
    %cst_29 = arith.constant dense<0xFF800000> : vector<8xf32>
    %107 = vector.multi_reduction <maximumf>, %106, %cst_29 [1] : vector<8x8xf32> to vector<8xf32>
    %108 = vector.shape_cast %107 : vector<8xf32> to vector<8x1xf32>
    %109 = vector.broadcast %108 : vector<8x1xf32> to vector<8x8xf32>
    %110 = arith.subf %106, %109 : vector<8x8xf32>
    %111 = math.exp %110 : vector<8x8xf32>
    %cst_30 = arith.constant dense<0.000000e+00> : vector<8xf32>
    %112 = vector.multi_reduction <add>, %111, %cst_30 [1] : vector<8x8xf32> to vector<8xf32>
    %113 = vector.shape_cast %112 : vector<8xf32> to vector<8x1xf32>
    %114 = tpu.reciprocal %113 {approx = true} : vector<8x1xf32> -> vector<8x1xf32>
    %115 = vector.broadcast %114 : vector<8x1xf32> to vector<8x8xf32>
    %116 = arith.mulf %111, %115 : vector<8x8xf32>
    %cst_31 = arith.constant dense<0.000000e+00> : vector<8x8xf32>
    %117 = tpu.matmul %116, %102, %cst_31 {dimension_numbers = #tpu.dot_dimension_numbers<[1], [0], [0], [1], [0, 0, 1, 1], [], []>} : vector<8x8xf32>, vector<8x8xf32>, vector<8x8xf32> -> vector<8x8xf32>
    %118 = tpu.concatenate %57, %77, %97, %117 in 1 : vector<8x8xf32>, vector<8x8xf32>, vector<8x8xf32>, vector<8x8xf32> -> vector<8x32xf32>
    %119 = vector.extract_strided_slice %2 {offsets = [1, 0], sizes = [1, 8], strides = [1, 1]} : vector<2x8xf32> to vector<1x8xf32>
    %120 = vector.extract_strided_slice %36 {offsets = [8, 0], sizes = [8, 8], strides = [1, 1]} : vector<16x96xf32> to vector<8x8xf32>
    %cst_32 = arith.constant 0.353553385 : f32
    %121 = vector.broadcast %cst_32 : f32 to vector<8x8xf32>
    %122 = arith.mulf %120, %121 : vector<8x8xf32>
    %123 = vector.extract_strided_slice %36 {offsets = [8, 32], sizes = [8, 8], strides = [1, 1]} : vector<16x96xf32> to vector<8x8xf32>
    %124 = vector.extract_strided_slice %36 {offsets = [8, 64], sizes = [8, 8], strides = [1, 1]} : vector<16x96xf32> to vector<8x8xf32>
    %125 = tpu.transpose %123, [1, 0] : vector<8x8xf32> -> vector<8x8xf32>
    %cst_33 = arith.constant dense<0.000000e+00> : vector<8x8xf32>
    %126 = tpu.matmul %122, %125, %cst_33 {dimension_numbers = #tpu.dot_dimension_numbers<[1], [0], [0], [1], [0, 0, 1, 1], [], []>} : vector<8x8xf32>, vector<8x8xf32>, vector<8x8xf32> -> vector<8x8xf32>
    %127 = vector.broadcast %119 : vector<1x8xf32> to vector<8x8xf32>
    %128 = arith.addf %126, %127 : vector<8x8xf32>
    %cst_34 = arith.constant dense<0xFF800000> : vector<8xf32>
    %129 = vector.multi_reduction <maximumf>, %128, %cst_34 [1] : vector<8x8xf32> to vector<8xf32>
    %130 = vector.shape_cast %129 : vector<8xf32> to vector<8x1xf32>
    %131 = vector.broadcast %130 : vector<8x1xf32> to vector<8x8xf32>
    %132 = arith.subf %128, %131 : vector<8x8xf32>
    %133 = math.exp %132 : vector<8x8xf32>
    %cst_35 = arith.constant dense<0.000000e+00> : vector<8xf32>
    %134 = vector.multi_reduction <add>, %133, %cst_35 [1] : vector<8x8xf32> to vector<8xf32>
    %135 = vector.shape_cast %134 : vector<8xf32> to vector<8x1xf32>
    %136 = tpu.reciprocal %135 {approx = true} : vector<8x1xf32> -> vector<8x1xf32>
    %137 = vector.broadcast %136 : vector<8x1xf32> to vector<8x8xf32>
    %138 = arith.mulf %133, %137 : vector<8x8xf32>
    %cst_36 = arith.constant dense<0.000000e+00> : vector<8x8xf32>
    %139 = tpu.matmul %138, %124, %cst_36 {dimension_numbers = #tpu.dot_dimension_numbers<[1], [0], [0], [1], [0, 0, 1, 1], [], []>} : vector<8x8xf32>, vector<8x8xf32>, vector<8x8xf32> -> vector<8x8xf32>
    %140 = vector.extract_strided_slice %36 {offsets = [8, 8], sizes = [8, 8], strides = [1, 1]} : vector<16x96xf32> to vector<8x8xf32>
    %cst_37 = arith.constant 0.353553385 : f32
    %141 = vector.broadcast %cst_37 : f32 to vector<8x8xf32>
    %142 = arith.mulf %140, %141 : vector<8x8xf32>
    %143 = vector.extract_strided_slice %36 {offsets = [8, 40], sizes = [8, 8], strides = [1, 1]} : vector<16x96xf32> to vector<8x8xf32>
    %144 = vector.extract_strided_slice %36 {offsets = [8, 72], sizes = [8, 8], strides = [1, 1]} : vector<16x96xf32> to vector<8x8xf32>
    %145 = tpu.transpose %143, [1, 0] : vector<8x8xf32> -> vector<8x8xf32>
    %cst_38 = arith.constant dense<0.000000e+00> : vector<8x8xf32>
    %146 = tpu.matmul %142, %145, %cst_38 {dimension_numbers = #tpu.dot_dimension_numbers<[1], [0], [0], [1], [0, 0, 1, 1], [], []>} : vector<8x8xf32>, vector<8x8xf32>, vector<8x8xf32> -> vector<8x8xf32>
    %147 = vector.broadcast %119 : vector<1x8xf32> to vector<8x8xf32>
    %148 = arith.addf %146, %147 : vector<8x8xf32>
    %cst_39 = arith.constant dense<0xFF800000> : vector<8xf32>
    %149 = vector.multi_reduction <maximumf>, %148, %cst_39 [1] : vector<8x8xf32> to vector<8xf32>
    %150 = vector.shape_cast %149 : vector<8xf32> to vector<8x1xf32>
    %151 = vector.broadcast %150 : vector<8x1xf32> to vector<8x8xf32>
    %152 = arith.subf %148, %151 : vector<8x8xf32>
    %153 = math.exp %152 : vector<8x8xf32>
    %cst_40 = arith.constant dense<0.000000e+00> : vector<8xf32>
    %154 = vector.multi_reduction <add>, %153, %cst_40 [1] : vector<8x8xf32> to vector<8xf32>
    %155 = vector.shape_cast %154 : vector<8xf32> to vector<8x1xf32>
    %156 = tpu.reciprocal %155 {approx = true} : vector<8x1xf32> -> vector<8x1xf32>
    %157 = vector.broadcast %156 : vector<8x1xf32> to vector<8x8xf32>
    %158 = arith.mulf %153, %157 : vector<8x8xf32>
    %cst_41 = arith.constant dense<0.000000e+00> : vector<8x8xf32>
    %159 = tpu.matmul %158, %144, %cst_41 {dimension_numbers = #tpu.dot_dimension_numbers<[1], [0], [0], [1], [0, 0, 1, 1], [], []>} : vector<8x8xf32>, vector<8x8xf32>, vector<8x8xf32> -> vector<8x8xf32>
    %160 = vector.extract_strided_slice %36 {offsets = [8, 16], sizes = [8, 8], strides = [1, 1]} : vector<16x96xf32> to vector<8x8xf32>
    %cst_42 = arith.constant 0.353553385 : f32
    %161 = vector.broadcast %cst_42 : f32 to vector<8x8xf32>
    %162 = arith.mulf %160, %161 : vector<8x8xf32>
    %163 = vector.extract_strided_slice %36 {offsets = [8, 48], sizes = [8, 8], strides = [1, 1]} : vector<16x96xf32> to vector<8x8xf32>
    %164 = vector.extract_strided_slice %36 {offsets = [8, 80], sizes = [8, 8], strides = [1, 1]} : vector<16x96xf32> to vector<8x8xf32>
    %165 = tpu.transpose %163, [1, 0] : vector<8x8xf32> -> vector<8x8xf32>
    %cst_43 = arith.constant dense<0.000000e+00> : vector<8x8xf32>
    %166 = tpu.matmul %162, %165, %cst_43 {dimension_numbers = #tpu.dot_dimension_numbers<[1], [0], [0], [1], [0, 0, 1, 1], [], []>} : vector<8x8xf32>, vector<8x8xf32>, vector<8x8xf32> -> vector<8x8xf32>
    %167 = vector.broadcast %119 : vector<1x8xf32> to vector<8x8xf32>
    %168 = arith.addf %166, %167 : vector<8x8xf32>
    %cst_44 = arith.constant dense<0xFF800000> : vector<8xf32>
    %169 = vector.multi_reduction <maximumf>, %168, %cst_44 [1] : vector<8x8xf32> to vector<8xf32>
    %170 = vector.shape_cast %169 : vector<8xf32> to vector<8x1xf32>
    %171 = vector.broadcast %170 : vector<8x1xf32> to vector<8x8xf32>
    %172 = arith.subf %168, %171 : vector<8x8xf32>
    %173 = math.exp %172 : vector<8x8xf32>
    %cst_45 = arith.constant dense<0.000000e+00> : vector<8xf32>
    %174 = vector.multi_reduction <add>, %173, %cst_45 [1] : vector<8x8xf32> to vector<8xf32>
    %175 = vector.shape_cast %174 : vector<8xf32> to vector<8x1xf32>
    %176 = tpu.reciprocal %175 {approx = true} : vector<8x1xf32> -> vector<8x1xf32>
    %177 = vector.broadcast %176 : vector<8x1xf32> to vector<8x8xf32>
    %178 = arith.mulf %173, %177 : vector<8x8xf32>
    %cst_46 = arith.constant dense<0.000000e+00> : vector<8x8xf32>
    %179 = tpu.matmul %178, %164, %cst_46 {dimension_numbers = #tpu.dot_dimension_numbers<[1], [0], [0], [1], [0, 0, 1, 1], [], []>} : vector<8x8xf32>, vector<8x8xf32>, vector<8x8xf32> -> vector<8x8xf32>
    %180 = vector.extract_strided_slice %36 {offsets = [8, 24], sizes = [8, 8], strides = [1, 1]} : vector<16x96xf32> to vector<8x8xf32>
    %cst_47 = arith.constant 0.353553385 : f32
    %181 = vector.broadcast %cst_47 : f32 to vector<8x8xf32>
    %182 = arith.mulf %180, %181 : vector<8x8xf32>
    %183 = vector.extract_strided_slice %36 {offsets = [8, 56], sizes = [8, 8], strides = [1, 1]} : vector<16x96xf32> to vector<8x8xf32>
    %184 = vector.extract_strided_slice %36 {offsets = [8, 88], sizes = [8, 8], strides = [1, 1]} : vector<16x96xf32> to vector<8x8xf32>
    %185 = tpu.transpose %183, [1, 0] : vector<8x8xf32> -> vector<8x8xf32>
    %cst_48 = arith.constant dense<0.000000e+00> : vector<8x8xf32>
    %186 = tpu.matmul %182, %185, %cst_48 {dimension_numbers = #tpu.dot_dimension_numbers<[1], [0], [0], [1], [0, 0, 1, 1], [], []>} : vector<8x8xf32>, vector<8x8xf32>, vector<8x8xf32> -> vector<8x8xf32>
    %187 = vector.broadcast %119 : vector<1x8xf32> to vector<8x8xf32>
    %188 = arith.addf %186, %187 : vector<8x8xf32>
    %cst_49 = arith.constant dense<0xFF800000> : vector<8xf32>
    %189 = vector.multi_reduction <maximumf>, %188, %cst_49 [1] : vector<8x8xf32> to vector<8xf32>
    %190 = vector.shape_cast %189 : vector<8xf32> to vector<8x1xf32>
    %191 = vector.broadcast %190 : vector<8x1xf32> to vector<8x8xf32>
    %192 = arith.subf %188, %191 : vector<8x8xf32>
    %193 = math.exp %192 : vector<8x8xf32>
    %cst_50 = arith.constant dense<0.000000e+00> : vector<8xf32>
    %194 = vector.multi_reduction <add>, %193, %cst_50 [1] : vector<8x8xf32> to vector<8xf32>
    %195 = vector.shape_cast %194 : vector<8xf32> to vector<8x1xf32>
    %196 = tpu.reciprocal %195 {approx = true} : vector<8x1xf32> -> vector<8x1xf32>
    %197 = vector.broadcast %196 : vector<8x1xf32> to vector<8x8xf32>
    %198 = arith.mulf %193, %197 : vector<8x8xf32>
    %cst_51 = arith.constant dense<0.000000e+00> : vector<8x8xf32>
    %199 = tpu.matmul %198, %184, %cst_51 {dimension_numbers = #tpu.dot_dimension_numbers<[1], [0], [0], [1], [0, 0, 1, 1], [], []>} : vector<8x8xf32>, vector<8x8xf32>, vector<8x8xf32> -> vector<8x8xf32>
    %200 = tpu.concatenate %139, %159, %179, %199 in 1 : vector<8x8xf32>, vector<8x8xf32>, vector<8x8xf32>, vector<8x8xf32> -> vector<8x32xf32>
    %201 = tpu.concatenate %118, %200 in 0 : vector<8x32xf32>, vector<8x32xf32> -> vector<16x32xf32>
    %c0_52 = arith.constant 0 : index
    %c96 = arith.constant 96 : index
    %202 = vector.load %arg3[%c0_52, %c96] : memref<32x128xf32, #tpu.memory_space<vmem>>, vector<32x32xf32>
    %cst_53 = arith.constant dense<0.000000e+00> : vector<16x32xf32>
    %203 = tpu.matmul %201, %202, %cst_53 {dimension_numbers = #tpu.dot_dimension_numbers<[1], [0], [0], [1], [0, 0, 1, 1], [], []>} : vector<16x32xf32>, vector<32x32xf32>, vector<16x32xf32> -> vector<16x32xf32>
    %204 = vector.broadcast %6 : vector<1x32xf32> to vector<16x32xf32>
    %205 = arith.addf %203, %204 : vector<16x32xf32>
    %206 = arith.addf %0, %205 : vector<16x32xf32>
    %cst_54 = arith.constant dense<0.000000e+00> : vector<16xf32>
    %207 = vector.multi_reduction <add>, %206, %cst_54 [1] : vector<16x32xf32> to vector<16xf32>
    %208 = vector.shape_cast %207 : vector<16xf32> to vector<16x1xf32>
    %cst_55 = arith.constant 3.200000e+01 : f32
    %209 = vector.broadcast %cst_55 : f32 to vector<16x1xf32>
    %210 = arith.divf %208, %209 : vector<16x1xf32>
    %211 = vector.broadcast %210 : vector<16x1xf32> to vector<16x32xf32>
    %212 = arith.subf %206, %211 : vector<16x32xf32>
    %213 = arith.mulf %212, %212 : vector<16x32xf32>
    %cst_56 = arith.constant dense<0.000000e+00> : vector<16xf32>
    %214 = vector.multi_reduction <add>, %213, %cst_56 [1] : vector<16x32xf32> to vector<16xf32>
    %215 = vector.shape_cast %214 : vector<16xf32> to vector<16x1xf32>
    %cst_57 = arith.constant 3.200000e+01 : f32
    %216 = vector.broadcast %cst_57 : f32 to vector<16x1xf32>
    %217 = arith.divf %215, %216 : vector<16x1xf32>
    %218 = vector.broadcast %210 : vector<16x1xf32> to vector<16x32xf32>
    %219 = arith.subf %206, %218 : vector<16x32xf32>
    %cst_58 = arith.constant 9.99999974E-6 : f32
    %220 = vector.broadcast %cst_58 : f32 to vector<16x1xf32>
    %221 = arith.addf %217, %220 : vector<16x1xf32>
    %222 = math.rsqrt %221 : vector<16x1xf32>
    %223 = vector.broadcast %222 : vector<16x1xf32> to vector<16x32xf32>
    %224 = arith.mulf %219, %223 : vector<16x32xf32>
    %225 = vector.broadcast %7 : vector<1x32xf32> to vector<16x32xf32>
    %226 = arith.mulf %224, %225 : vector<16x32xf32>
    %227 = vector.broadcast %8 : vector<1x32xf32> to vector<16x32xf32>
    %228 = arith.addf %226, %227 : vector<16x32xf32>
    %c0_59 = arith.constant 0 : index
    %c0_60 = arith.constant 0 : index
    %229 = vector.load %arg4[%c0_59, %c0_60] : memref<160x128xf32, #tpu.memory_space<vmem>>, vector<32x128xf32>
    %cst_61 = arith.constant dense<0.000000e+00> : vector<16x128xf32>
    %230 = tpu.matmul %228, %229, %cst_61 {dimension_numbers = #tpu.dot_dimension_numbers<[1], [0], [0], [1], [0, 0, 1, 1], [], []>} : vector<16x32xf32>, vector<32x128xf32>, vector<16x128xf32> -> vector<16x128xf32>
    %231 = vector.broadcast %9 : vector<1x128xf32> to vector<16x128xf32>
    %232 = arith.addf %230, %231 : vector<16x128xf32>
    %cst_62 = arith.constant 0.000000e+00 : f32
    %233 = vector.broadcast %cst_62 : f32 to vector<16x128xf32>
    %234 = arith.maximumf %232, %233 : vector<16x128xf32>
    %c32 = arith.constant 32 : index
    %c0_63 = arith.constant 0 : index
    %235 = vector.load %arg4[%c32, %c0_63] : memref<160x128xf32, #tpu.memory_space<vmem>>, vector<128x32xf32>
    %cst_64 = arith.constant dense<0.000000e+00> : vector<16x32xf32>
    %236 = tpu.matmul %234, %235, %cst_64 {dimension_numbers = #tpu.dot_dimension_numbers<[1], [0], [0], [1], [0, 0, 1, 1], [], []>} : vector<16x128xf32>, vector<128x32xf32>, vector<16x32xf32> -> vector<16x32xf32>
    %237 = vector.broadcast %10 : vector<1x32xf32> to vector<16x32xf32>
    %238 = arith.addf %236, %237 : vector<16x32xf32>
    %239 = arith.addf %206, %238 : vector<16x32xf32>
    %c0_65 = arith.constant 0 : index
    %c0_66 = arith.constant 0 : index
    %240 = vector.load %arg5[%c0_65, %c0_66] : memref<16x32xf32, #tpu.memory_space<vmem>>, vector<16x32xf32>
    tpu.vector_store %arg5[%c0_65, %c0_66], %239 {strides = array<i32>} : memref<16x32xf32, #tpu.memory_space<vmem>>, vector<16x32xf32>,
    return
  }
}

</mosaic_0001>

<bundles_post_ra>
// kernel: tpu_custom_call.1
= control target key start
LH: loop header
LB: loop body
LE: loop exit
PB: predicated region body
PF: predicated region fallthrough
CT: control target
= control target key end

     0   :  { %10 = vsyncpa [#allocation3], 0  ;;  %s1516_s0 = inlined_call_operand.hbm [shape: f32[16,32], index: 0, kind: input, shape index: {}]   ;;  %s1517_s1 = inlined_call_operand.hbm [shape: f32[2,8], index: 1, kind: input, shape index: {}]   ;;  %s1518_s2 = inlined_call_operand.hbm [shape: f32[8,128], index: 2, kind: input, shape index: {}]   ;;  %s1519_s3 = inlined_call_operand.hbm [shape: f32[32,128], index: 3, kind: input, shape index: {}]   ;;  %s1520_s4 = inlined_call_operand.hbm [shape: f32[160,128], index: 4, kind: input, shape index: {}]   ;;  %s1521_s5 = inlined_call_operand.hbm [shape: f32[16,32], index: 5, kind: output, shape index: {}]  }
   0x1   :  { %11 = vsyncpa [#allocation6], 0 }
   0x2   :  { %12 = vsyncpa [#allocation9], 0  ;;  %s32_s20 = sshll.u32 %s1517_s1, 4  ;;  %s33_s20 = int_to_ptr.hbm [resolvable:$true] %s32_s20 }
   0x3   :  { %13 = vsyncpa [#allocation4], 0  ;;  %s1204_s21 = smov [#allocation5]   ;;  %s53_s25 = sshll.u32 %s1519_s3, 4  ;;  %s54_s25 = int_to_ptr.hbm [resolvable:$true] %s53_s25 }
   0x4   :  { %s34_s22 = sshll.u32 %s1204_s21, 4  ;;  %s1205_s26 = smov [#allocation8]   ;;  %s35_s22 = int_to_ptr.vmem [resolvable:$true] %s34_s22 }
   0x5   :  { %37 = dma.hbm_to_vmem [thread:$0]  %s33_s20, 32, %s35_s22, [#allocation6]  }
   0x6   :  { %s55_s27 = sshll.u32 %s1205_s26, 4  ;;  %s18_s30 = sshll.u32 %s1516_s0, 4  ;;  %s56_s27 = int_to_ptr.vmem [resolvable:$true] %s55_s27  ;;  %s19_s30 = int_to_ptr.hbm [resolvable:$true] %s18_s30 }
   0x7   :  { %s1206_s1 = smov 128   ;;  %s1207_s6 = smov 8  }
   0x8   :  { %61 = dma.hbm_to_vmem [thread:$0]  %s54_s25, 512, %s56_s27, [#allocation9], %s1206_s1, %s1206_s1, %s1207_s6  }
   0x9   :  { %s43_s9 = sshll.u32 %s1518_s2, 4  ;;  %s1208_s3 = smov [#allocation2]   ;;  %s44_s9 = int_to_ptr.hbm [resolvable:$true] %s43_s9 }
   0xa   :  { %s20_s10 = sshll.u32 %s1208_s3, 4  ;;  %s1209_s0 = smov [#allocation7]   ;;  %s21_s10 = int_to_ptr.vmem [resolvable:$true] %s20_s10 }
   0xb   :  { %26 = dma.hbm_to_vmem [thread:$0]  %s19_s30, 256, %s21_s10, [#allocation3], %s1206_s1, %s1206_s1, %s1207_s6  }
   0xc   :  { %s45_s11 = sshll.u32 %s1209_s0, 4  ;;  %s66_s14 = sshll.u32 %s1520_s4, 4  ;;  %s46_s11 = int_to_ptr.vmem [resolvable:$true] %s45_s11  ;;  %s67_s14 = int_to_ptr.hbm [resolvable:$true] %s66_s14 }
   0xd   :  { %48 = dma.hbm_to_vmem [thread:$0]  %s44_s9, 128, %s46_s11, [#allocation6]  }
   0xe   :  { %s1210_s15 = smov [#allocation10]  }
   0xf   :  { %s68_s16 = sshll.u32 %s1210_s15, 4  ;;  %s69_s16 = int_to_ptr.vmem [resolvable:$true] %s68_s16 }
  0x10   :  { %74 = dma.hbm_to_vmem [thread:$0]  %s67_s14, 2560, %s69_s16, [#allocation9], %s1206_s1, %s1206_s1, %s1207_s6  }
  0x11   :  { %1196 = dma.done.wait [#allocation3], 256  }
  0x12   :  { %1197 = vsyncadd [#allocation3], 4294967040 }
  0x13   :  { %1198 = dma.done.wait [#allocation6], 160  }
  0x14   :  { %1199 = vsyncadd [#allocation6], 4294967136 }
  0x15   :  { %1200 = dma.done.wait [#allocation9], 3072  }
  0x16   :  { %1201 = vsyncadd [#allocation9], 4294964224  ;;  %vm99_vm0 = vcmask 261120   ;;  %v1281_v0 = vld [vmem:[#allocation2] sm:$0xff]  ;;  %v1211_v2 = vmov 32.0   ;;  %v1290_v14 = vld [vmem:[#allocation8 + $0x18] sm:$0xff] }
  0x17   :  { %v100_v1 = vsel %vm99_vm0, %v1281_v0, 0.0  ;;  %1010 = vrcp.f32 %v1211_v2  ;;  %180 = vmatpush.msra.mxu0 %v1290_v14  ;;  %v1293_v15 = vld [vmem:[#allocation8 + $0x10] sm:$0xff]  ;;  %v1295_v16 = vld [vmem:[#allocation8 + $0x8] sm:$0xff]  ;;  %v1297_v17 = vld [vmem:[#allocation8] sm:$0xff]  ;;  %s1212_s2 = smov 88   ;;  %s1213_s4 = smov 96  }
  0x18   :  { %101 = vadd.xlane.f32.xlu0 %v100_v1  ;;  %v1000_v18 = vpack.i.bf16 %v1293_v15, %v1290_v14  ;;  %v1005_v19 = vpack.i.bf16 %v1297_v17, %v1295_v16  ;;  %v1307_v28 = vld [vmem:[#allocation7] sm:$0xff]  ;;  %s1214_s17 = smov 120   ;;  %s1215_s18 = smov 64   ;;  %v1334_v40 = vld [vmem:[#allocation2 + $0x8] sm:$0xff]  ;;  %vm196_vm5 = vcmask 64512   ;;  %vm467_vm9 = vcmask 130048  }
  0x19   :  { %181 = vmatpush.msra.mxu0 %v1293_v15  ;;  %v151_v30 = vperm.slane %v1307_v28, 0  ;;  %v154_v33 = vperm.slane %v1307_v28, 1  ;;  %v161_v36 = vperm.slane %v1307_v28, 2  ;;  %s1216_s19 = smov 80   ;;  %v103_v41 = vsel %vm99_vm0, %v1334_v40, 0.0  ;;  %s1217_s20 = smov 56  }
  0x1a   :  { %v1346_v49 = vld [vmem:[#allocation5] sm:$0x3]  ;;  %s1218_s21 = smov 48   ;;  %s1219_s22 = smov 104   ;;  %vm469_vm10 = vcmask 195584  }
  0x1b   :  { %182 = vmatpush.msra.mxu0 %v1295_v16  ;;  %v1350_v51 = vperm.slane %v1346_v49, 0  ;;  %s1220_s23 = smov 112   ;;  %s1221_s24 = smov 72  }
  0x1c   :  { %s1222_s25 = smov 40   ;;  %s1223_s26 = smov 16  }
  0x1d   :  { %v1011_v3 = vpop.eup %1010  ;;  %183 = vmatpush.msra.mxu0 %v1297_v17  ;;  %s1224_s27 = smov 32   ;;  %s1225_s28 = smov 24  }
  0x1e   :  { %v107_v4 = vmul.f32 32.0, %v1011_v3  ;;  %vm111_vm1 = vweird.f32 %v1011_v3  ;;  %s1226_s29 = smov [#allocation11]   ;;  %s932_s9 = sshll.u32 %s1521_s5, 4  ;;  %s933_s9 = int_to_ptr.hbm [resolvable:$true] %s932_s9 }
  0x1f   :  { %s930_s30 = sshll.u32 %s1226_s29, 4  ;;  %s931_s30 = int_to_ptr.vmem [resolvable:$true] %s930_s30 }
  0x20   :  { %v108_v5 = vsub.f32 1.0, %v107_v4 }
  0x22   :  { %v109_v6 = vmul.f32 %v1011_v3, %v108_v5 }
  0x24   :  { %v110_v7 = vadd.f32 %v1011_v3, %v109_v6 }
  0x26   :  { %v1285_v8 = vsel %vm111_vm1, %v1011_v3, %v110_v7 }
  0x8b   :  { %v102_v9 = vpop.xlane.xlu0 %101 }
  0x8c   :  { %v113_v10 = vmul.f32 %v1285_v8, %v102_v9 }
  0x8e   :  { %v115_v11 = vsub.f32 %v1281_v0, %v113_v10 }
  0x90   :  { %v117_v12 = vmul.f32 %v115_v11, %v115_v11 }
  0x92   :  { %v119_v13 = vsel %vm99_vm0, %v117_v12, 0.0 }
  0x93   :  { %120 = vadd.xlane.f32.xlu0 %v119_v13 }
 0x106   :  { %v121_v20 = vpop.xlane.xlu0 %120 }
 0x107   :  { %v125_v21 = vmul.f32 %v121_v20, %v1285_v8 }
 0x109   :  { %v127_v22 = vadd.f32 1e-05, %v125_v21 }
 0x10b   :  { %1012 = vrsqrt.f32 %v127_v22  ;;  %vm135_vm3 = vweird.f32 %v127_v22 }
 0x111   :  { %v1013_v23 = vpop.eup %1012 }
 0x112   :  { %v130_v24 = vmul.f32 %v1013_v23, %v127_v22  ;;  %vm136_vm2 = vweird.f32 %v1013_v23 }
 0x113   :  { %vm137_vm4 = vmor %vm135_vm3, %vm136_vm2 }
 0x114   :  { %v131_v25 = vmul.f32 %v1013_v23, %v130_v24 }
 0x116   :  { %v132_v26 = vmul.f32 0.5, %v131_v25 }
 0x118   :  { %v133_v27 = vsub.f32 1.5, %v132_v26 }
 0x11a   :  { %v134_v29 = vmul.f32 %v1013_v23, %v133_v27 }
 0x11c   :  { %v138_v31 = vsel %vm137_vm4, %v1013_v23, %v134_v29 }
 0x11d   :  { %v149_v32 = vmul.f32 %v138_v31, %v115_v11 }
 0x11f   :  { %v152_v34 = vmul.f32 %v151_v30, %v149_v32 }
 0x121   :  { %v155_v35 = vadd.f32 %v154_v33, %v152_v34 }
 0x123   :  { %947 = vmatmul.msk.f32.vlgmr.msra.gmra.mxu0 %vm99_vm0, %v155_v35 }
 0x1a0   :  { %v185_v37 = vpop.f32.mrf.mxu0 }
 0x1a1   :  { %v1319_v38 = vadd.f32 %v185_v37, %v161_v36 }
 0x1a3   :  { %261 = vrot.lane.b32.xlu2 %v1319_v38, %s1212_s2  ;;  %194 = vrot.lane.b32.xlu1 %v1319_v38, %s1213_s4  ;;  %v1326_v39 = vmul.f32 0.35355338, %v1319_v38 }
 0x1a5   :  { %259 = vrot.lane.b32.xlu0 %v1326_v39, %s1214_s17 }
 0x1ab   :  { %233 = vrot.lane.b32.xlu2 %v1319_v38, %s1215_s18 }
 0x1b3   :  { %326 = vrot.lane.b32.xlu2 %v1319_v38, %s1216_s19 }
 0x1cf   :  { %104 = vadd.xlane.f32.xlu0 %v103_v41 }
 0x1e3   :  { %298 = vrot.lane.b32.xlu0 %v1319_v38, %s1217_s20 }
 0x1fd   :  { %v262_v42 = vpop.permute.xlu2 %261 }
 0x1fe   :  { %952 = vmatpush.xpose.msk.msra.mxu3 %vm196_vm5, %v262_v42 }
 0x205   :  { %v234_v43 = vpop.permute.xlu2 %233 }
 0x20d   :  { %v327_v46 = vpop.permute.xlu2 %326 }
 0x215   :  { %v195_v44 = vpop.permute.xlu1 %194 }
 0x216   :  { %949 = vmatpush.xpose.msk.msra.mxu1 %vm196_vm5, %v195_v44 }
 0x217   :  { %v260_v45 = vpop.permute.xlu0 %259 }
 0x218   :  { %953 = vmatmul.msk.f32.vlgmr.msra.gmra.mxu3 %vm196_vm5, %v260_v45 }
 0x219   :  { %950 = vmatmul.msk.f32.vlgmr.msra.gmra.mxu1 %vm196_vm5, %v1326_v39 }
 0x21a   :  { %254 = vmatpush.msrb.mxu1 %v234_v43 }
 0x21c   :  { %955 = vmatpush.xpose.msk.msra.mxu1 %vm196_vm5, %v327_v46 }
 0x242   :  { %v105_v47 = vpop.xlane.xlu0 %104 }
 0x243   :  { %v114_v50 = vmul.f32 %v1285_v8, %v105_v47 }
 0x245   :  { %v116_v53 = vsub.f32 %v1334_v40, %v114_v50 }
 0x247   :  { %v118_v56 = vmul.f32 %v116_v53, %v116_v53 }
 0x249   :  { %v122_v57 = vsel %vm99_vm0, %v118_v56, 0.0 }
 0x255   :  { %v299_v48 = vpop.permute.xlu0 %298 }
 0x256   :  { %319 = vmatpush.msrb.mxu3 %v299_v48 }
 0x296   :  { %v219_v52 = vpop.f32.mrf.mxu1 }
 0x297   :  { %v220_v54 = vadd.f32 %v219_v52, %v1350_v51 }
 0x299   :  { %v222_v55 = vsel %vm196_vm5, %v220_v54, -inf }
 0x29a   :  { %223 = vmax.xlane.f32.xlu1 %v222_v55 }
 0x29b   :  { %v284_v21 = vpop.f32.mrf.mxu3 }
 0x29c   :  { %v285_v22 = vadd.f32 %v284_v21, %v1350_v51 }
 0x29e   :  { %v287_v23 = vsel %vm196_vm5, %v285_v22, -inf }
 0x2a2   :  { %123 = vadd.xlane.f32.xlu1 %v122_v57 }
 0x2bb   :  { %363 = vrot.lane.b32.xlu1 %v1319_v38, %s1218_s21 }
 0x2c3   :  { %389 = vrot.lane.b32.xlu1 %v1326_v39, %s1219_s22 }
 0x30d   :  { %v224_v58 = vpop.xlane.xlu1 %223 }
 0x30e   :  { %v225_v59 = vsub.f32 %v220_v54, %v224_v58 }
 0x310   :  { %v226_v60 = vmul.f32 1.442695, %v225_v59 }
 0x312   :  { %1014 = vpow2.f32 %v226_v60 }
 0x315   :  { %v124_v61 = vpop.xlane.xlu1 %123 }
 0x316   :  { %v126_v62 = vmul.f32 %v124_v61, %v1285_v8 }
 0x318   :  { %v1015_v63 = vpop.eup %1014  ;;  %v128_v1 = vadd.f32 1e-05, %v126_v62 }
 0x319   :  { %v228_v2 = vsel %vm196_vm5, %v1015_v63, 0.0 }
 0x31a   :  { %229 = vadd.xlane.f32.xlu2 %v228_v2  ;;  %1016 = vrsqrt.f32 %v128_v1  ;;  %vm145_vm6 = vweird.f32 %v128_v1 }
 0x320   :  { %v1017_v3 = vpop.eup %1016 }
 0x321   :  { %v140_v4 = vmul.f32 %v1017_v3, %v128_v1  ;;  %vm146_vm7 = vweird.f32 %v1017_v3 }
 0x322   :  { %vm147_vm8 = vmor %vm145_vm6, %vm146_vm7 }
 0x323   :  { %v141_v5 = vmul.f32 %v1017_v3, %v140_v4 }
 0x325   :  { %v142_v6 = vmul.f32 0.5, %v141_v5 }
 0x327   :  { %v143_v7 = vsub.f32 1.5, %v142_v6 }
 0x329   :  { %v144_v9 = vmul.f32 %v1017_v3, %v143_v7 }
 0x32b   :  { %v148_v10 = vsel %vm147_vm8, %v1017_v3, %v144_v9 }
 0x32c   :  { %v150_v11 = vmul.f32 %v148_v10, %v116_v53 }
 0x32d   :  { %v364_v12 = vpop.permute.xlu1 %363 }
 0x32e   :  { %384 = vmatpush.msra.mxu3 %v364_v12  ;;  %v153_v13 = vmul.f32 %v151_v30, %v150_v11 }
 0x330   :  { %v156_v20 = vadd.f32 %v154_v33, %v153_v13 }
 0x332   :  { %324 = vrot.lane.b32.xlu2 %v1326_v39, %s1220_s23  ;;  %948 = vmatmul.msk.f32.gmra.mxu0 %vm99_vm0, %v156_v20 }
 0x335   :  { %v390_v37 = vpop.permute.xlu1 %389 }
 0x35b   :  { %288 = vmax.xlane.f32.xlu2 %v287_v23 }
 0x373   :  { %391 = vrot.lane.b32.xlu2 %v1319_v38, %s1221_s24 }
 0x38d   :  { %v230_v24 = vpop.xlane.xlu2 %229 }
 0x38e   :  { %1018 = vrcp.f32 %v230_v24 }
 0x394   :  { %v1019_v25 = vpop.eup %1018 }
 0x395   :  { %v232_v26 = vmul.f32 %v1019_v25, %v1015_v63  ;;  %v325_v27 = vpop.permute.xlu2 %324 }
 0x397   :  { %951 = vmatmul.msk.f32.vlgmr.msrb.gmra.mxu1 %vm196_vm5, %v232_v26 }
 0x39f   :  { %956 = vmatmul.msk.f32.vlgmr.msra.gmra.mxu1 %vm196_vm5, %v325_v27 }
 0x3af   :  { %v188_v29 = vpop.f32.mrf.mxu0 }
 0x3b0   :  { %v1375_v30 = vadd.f32 %v188_v29, %v161_v36 }
 0x3b2   :  { %474 = vrot.lane.b32.xlu0 %v1375_v30, %s1213_s4  ;;  %670 = vrot.lane.b32.xlu2 %v1375_v30, %s1221_s24  ;;  %v1383_v31 = vmul.f32 0.35355338, %v1375_v30 }
 0x3ba   :  { %540 = vrot.lane.b32.xlu0 %v1375_v30, %s1212_s2 }
 0x3c2   :  { %538 = vrot.lane.b32.xlu0 %v1383_v31, %s1214_s17 }
 0x3ca   :  { %603 = vrot.lane.b32.xlu0 %v1383_v31, %s1220_s23 }
 0x3ce   :  { %v289_v32 = vpop.xlane.xlu2 %288 }
 0x3cf   :  { %v290_v33 = vsub.f32 %v285_v22, %v289_v32 }
 0x3d1   :  { %v291_v34 = vmul.f32 1.442695, %v290_v33 }
 0x3d3   :  { %1020 = vpow2.f32 %v291_v34 }
 0x3d6   :  { %v392_v35 = vpop.permute.xlu2 %391 }
 0x3d7   :  { %958 = vmatpush.xpose.msk.msrb.mxu1 %vm196_vm5, %v392_v35 }
 0x3d9   :  { %v1021_v36 = vpop.eup %1020 }
 0x3da   :  { %959 = vmatmul.msk.f32.vlgmr.msrb.gmra.mxu1 %vm196_vm5, %v390_v37  ;;  %v293_v39 = vsel %vm196_vm5, %v1021_v36, 0.0 }
 0x3db   :  { %294 = vadd.xlane.f32.xlu1 %v293_v39 }
 0x40c   :  { %v671_v46 = vpop.permute.xlu2 %670 }
 0x414   :  { %v1391_v41 = vpop.f32.mrf.mxu1 }
 0x41c   :  { %v349_v42 = vpop.f32.mrf.mxu1 }
 0x41d   :  { %v350_v43 = vadd.f32 %v349_v42, %v1350_v51 }
 0x41f   :  { %v352_v44 = vsel %vm196_vm5, %v350_v43, -inf }
 0x420   :  { %353 = vmax.xlane.f32.xlu1 %v352_v44 }
 0x424   :  { %v475_v45 = vpop.permute.xlu0 %474 }
 0x42c   :  { %v541_v47 = vpop.permute.xlu0 %540 }
 0x42d   :  { %964 = vmatpush.xpose.msk.msra.mxu2 %vm196_vm5, %v541_v47 }
 0x431   :  { %970 = vmatpush.xpose.msk.msrb.mxu2 %vm196_vm5, %v671_v46 }
 0x434   :  { %v539_v48 = vpop.permute.xlu0 %538 }
 0x435   :  { %965 = vmatmul.msk.f32.vlgmr.msra.gmra.mxu2 %vm196_vm5, %v539_v48 }
 0x439   :  { %605 = vrot.lane.b32.xlu1 %v1375_v30, %s1216_s19 }
 0x43c   :  { %v604_v12 = vpop.permute.xlu0 %603 }
 0x44e   :  { %v295_v50 = vpop.xlane.xlu1 %294 }
 0x44f   :  { %1022 = vrcp.f32 %v295_v50 }
 0x455   :  { %v1023_v52 = vpop.eup %1022 }
 0x456   :  { %v297_v53 = vmul.f32 %v1023_v52, %v1021_v36 }
 0x457   :  { %v414_v54 = vpop.f32.mrf.mxu1 }
 0x458   :  { %v415_v55 = vadd.f32 %v414_v54, %v1350_v51  ;;  %954 = vmatmul.msk.f32.vlgmr.msrb.gmra.mxu3 %vm196_vm5, %v297_v53  ;;  %v1408_v51 = vperm.slane %v1346_v49, 1 }
 0x459   :  { %961 = vmatpush.xpose.msk.msrb.mxu3 %vm196_vm5, %v475_v45 }
 0x45a   :  { %v417_v56 = vsel %vm196_vm5, %v415_v55, -inf }
 0x45b   :  { %418 = vmax.xlane.f32.xlu2 %v417_v56 }
 0x493   :  { %v354_v57 = vpop.xlane.xlu1 %353 }
 0x494   :  { %v355_v58 = vsub.f32 %v350_v43, %v354_v57 }
 0x496   :  { %v356_v59 = vmul.f32 1.442695, %v355_v58 }
 0x498   :  { %1024 = vpow2.f32 %v356_v59 }
 0x49e   :  { %v1025_v60 = vpop.eup %1024 }
 0x49f   :  { %v358_v61 = vsel %vm196_vm5, %v1025_v60, 0.0 }
 0x4a0   :  { %359 = vadd.xlane.f32.xlu1 %v358_v61 }
 0x4ab   :  { %v606_v7 = vpop.permute.xlu1 %605 }
 0x4b8   :  { %v563_v1 = vpop.f32.mrf.mxu2 }
 0x4b9   :  { %668 = vrot.lane.b32.xlu1 %v1383_v31, %s1219_s22  ;;  %v564_v2 = vadd.f32 %v563_v1, %v1408_v51 }
 0x4bb   :  { %v566_v4 = vsel %vm196_vm5, %v564_v2, -inf }
 0x4ce   :  { %v419_v62 = vpop.xlane.xlu2 %418 }
 0x4cf   :  { %v420_v63 = vsub.f32 %v415_v55, %v419_v62 }
 0x4d1   :  { %v421_v3 = vmul.f32 1.442695, %v420_v63 }
 0x4d3   :  { %1026 = vpow2.f32 %v421_v3 }
 0x4d9   :  { %v1027_v5 = vpop.eup %1026 }
 0x4da   :  { %v423_v6 = vsel %vm196_vm5, %v1027_v5, 0.0 }
 0x4db   :  { %v321_v23 = vpop.f32.mrf.mxu3 }
 0x4e3   :  { %567 = vmax.xlane.f32.xlu1 %v566_v4 }
 0x4eb   :  { %424 = vadd.xlane.f32.xlu1 %v423_v6 }
 0x504   :  { %428 = vrot.lane.b32.xlu1 %v1319_v38, %s1222_s25 }
 0x50c   :  { %642 = vrot.lane.b32.xlu1 %v1375_v30, %s1218_s21 }
 0x513   :  { %v360_v49 = vpop.xlane.xlu1 %359 }
 0x514   :  { %1028 = vrcp.f32 %v360_v49  ;;  %1001 = vrot.lane.b32.xlu1 %v1000_v18, %s1224_s27 }
 0x51a   :  { %v1029_v9 = vpop.eup %1028 }
 0x51b   :  { %v362_v10 = vmul.f32 %v1029_v9, %v1025_v60 }
 0x51c   :  { %1006 = vrot.lane.b32.xlu1 %v1005_v19, %s1224_s27 }
 0x51d   :  { %957 = vmatmul.msk.f32.vlgmr.msra.gmra.mxu3 %vm196_vm5, %v362_v10 }
 0x51e   :  { %967 = vmatpush.xpose.msk.msra.mxu3 %vm196_vm5, %v606_v7 }
 0x525   :  { %962 = vmatmul.msk.f32.vlgmr.msrb.gmra.mxu3 %vm196_vm5, %v1383_v31 }
 0x52b   :  { %v669_v11 = vpop.permute.xlu1 %668 }
 0x52c   :  { %971 = vmatmul.msk.f32.vlgmr.msrb.gmra.mxu2 %vm196_vm5, %v669_v11 }
 0x52d   :  { %968 = vmatmul.msk.f32.vlgmr.msra.gmra.mxu3 %vm196_vm5, %v604_v12 }
 0x556   :  { %v568_v38 = vpop.xlane.xlu1 %567 }
 0x557   :  { %v569_v27 = vsub.f32 %v564_v2, %v568_v38 }
 0x559   :  { %v570_v31 = vmul.f32 1.442695, %v569_v27 }
 0x55e   :  { %v425_v13 = vpop.xlane.xlu1 %424 }
 0x55f   :  { %1030 = vrcp.f32 %v425_v13 }
 0x560   :  { %1032 = vpow2.f32 %v570_v31 }
 0x565   :  { %v1031_v20 = vpop.eup %1030 }
 0x566   :  { %v427_v21 = vmul.f32 %v1031_v20, %v1027_v5  ;;  %v1428_v35 = vpop.eup %1032 }
 0x567   :  { %v572_v36 = vsel %vm196_vm5, %v1428_v35, 0.0 }
 0x576   :  { %v429_v22 = vpop.permute.xlu1 %428 }
 0x577   :  { %449 = vmatpush.msra.mxu1 %v429_v22 }
 0x578   :  { %960 = vmatmul.msk.f32.vlgmr.msra.gmra.mxu1 %vm196_vm5, %v427_v21 }
 0x57e   :  { %v643_v56 = vpop.permute.xlu1 %642 }
 0x586   :  { %v1002_v17 = vpop.permute.xlu1 %1001 }
 0x587   :  { %v1004_v19 = vunpack.i.h.bf16 %v1002_v17  ;;  %v1003_v63 = vunpack.i.l.bf16 %v1002_v17 }
 0x589   :  { %783 = vmatpush.msrb.mxu3 %v1003_v63  ;;  %v897_v63 = vld [vmem:[#allocation10 + $0x98] sm:$0xff] }
 0x58a   :  { %899 = vmatpush.msra.mxu2 %v897_v63 }
 0x58b   :  { %784 = vmatpush.msrb.mxu3 %v1004_v19 }
 0x58e   :  { %v1007_v1 = vpop.permute.xlu1 %1006 }
 0x58f   :  { %v1009_v2 = vunpack.i.h.bf16 %v1007_v1  ;;  %v1008_v3 = vunpack.i.l.bf16 %v1007_v1  ;;  %v896_v1 = vld [vmem:[#allocation10 + $0x90] sm:$0xff] }
 0x590   :  { %900 = vmatpush.msra.mxu2 %v896_v1 }
 0x591   :  { %785 = vmatpush.msrb.mxu3 %v1008_v3  ;;  %v894_v3 = vld [vmem:[#allocation10 + $0x80] sm:$0xff] }
 0x593   :  { %786 = vmatpush.msrb.mxu3 %v1009_v2  ;;  %v895_v2 = vld [vmem:[#allocation10 + $0x88] sm:$0xff] }
 0x594   :  { %901 = vmatpush.msra.mxu2 %v895_v2 }
 0x596   :  { %902 = vmatpush.msra.mxu2 %v894_v3 }
 0x5a0   :  { %v386_v24 = vpop.f32.mrf.mxu3 }
 0x5a8   :  { %v498_v25 = vpop.f32.mrf.mxu3 }
 0x5a9   :  { %v499_v26 = vadd.f32 %v498_v25, %v1408_v51 }
 0x5ab   :  { %v501_v29 = vsel %vm196_vm5, %v499_v26, -inf }
 0x5ac   :  { %502 = vmax.xlane.f32.xlu0 %v501_v29 }
 0x5af   :  { %v693_v32 = vpop.f32.mrf.mxu2 }
 0x5b0   :  { %v694_v33 = vadd.f32 %v693_v32, %v1408_v51  ;;  %v628_v47 = vpop.f32.mrf.mxu3 }
 0x5b1   :  { %v629_v50 = vadd.f32 %v628_v47, %v1408_v51 }
 0x5b2   :  { %v696_v34 = vsel %vm196_vm5, %v694_v33, -inf }
 0x5b3   :  { %v631_v53 = vsel %vm196_vm5, %v629_v50, -inf }
 0x5b4   :  { %697 = vmax.xlane.f32.xlu0 %v696_v34 }
 0x5bc   :  { %573 = vadd.xlane.f32.xlu0 %v572_v36 }
 0x5d0   :  { %512 = vrot.lane.b32.xlu0 %v1375_v30, %s1215_s18 }
 0x5d8   :  { %707 = vrot.lane.b32.xlu0 %v1375_v30, %s1222_s25 }
 0x5e0   :  { %455 = vrot.lane.b32.xlu0 %v321_v23, %s1207_s6 }
 0x5e8   :  { %459 = vrot.lane.b32.xlu0 %v386_v24, %s1223_s26 }
 0x5f5   :  { %v451_v16 = vpop.f32.mrf.mxu1 }
 0x61f   :  { %v503_v37 = vpop.xlane.xlu0 %502 }
 0x620   :  { %v504_v45 = vsub.f32 %v499_v26, %v503_v37 }
 0x622   :  { %v505_v48 = vmul.f32 1.442695, %v504_v45 }
 0x627   :  { %v698_v39 = vpop.xlane.xlu0 %697 }
 0x628   :  { %v699_v42 = vsub.f32 %v694_v33, %v698_v39 }
 0x62a   :  { %v700_v43 = vmul.f32 1.442695, %v699_v42 }
 0x62c   :  { %1034 = vpow2.f32 %v700_v43 }
 0x62d   :  { %1036 = vpow2.f32 %v505_v48 }
 0x62f   :  { %v574_v52 = vpop.xlane.xlu0 %573 }
 0x632   :  { %v1438_v44 = vpop.eup %1034 }
 0x633   :  { %v702_v46 = vsel %vm196_vm5, %v1438_v44, 0.0  ;;  %v1037_v54 = vpop.eup %1036 }
 0x634   :  { %703 = vadd.xlane.f32.xlu2 %v702_v46  ;;  %v507_v57 = vsel %vm196_vm5, %v1037_v54, 0.0 }
 0x63c   :  { %632 = vmax.xlane.f32.xlu2 %v631_v53  ;;  %v848_v53 = vld [vmem:[#allocation10 + $0x10] sm:$0xff] }
 0x642   :  { %v513_v55 = vpop.permute.xlu0 %512 }
 0x643   :  { %533 = vmatpush.msrb.mxu0 %v513_v55  ;;  %v846_v55 = vld [vmem:[#allocation10] sm:$0xff] }
 0x644   :  { %508 = vadd.xlane.f32.xlu2 %v507_v57 }
 0x645   :  { %663 = vmatpush.msra.mxu0 %v643_v56 }
 0x64a   :  { %v708_v4 = vpop.permute.xlu0 %707 }
 0x652   :  { %v456_v6 = vpop.permute.xlu0 %455 }
 0x653   :  { %v466_v38 = vsel %vm196_vm5, %v1391_v41, %v456_v6  ;;  %v748_v41 = vperm.slane %v1307_v28, 3  ;;  %v891_v6 = vld [vmem:[#allocation10 + $0x68] sm:$0xff] }
 0x65a   :  { %v460_v12 = vpop.permute.xlu0 %459 }
 0x65b   :  { %v468_v13 = vsel %vm467_vm9, %v466_v38, %v460_v12 }
 0x6a7   :  { %v704_v58 = vpop.xlane.xlu2 %703 }
 0x6af   :  { %v633_v59 = vpop.xlane.xlu2 %632 }
 0x6b0   :  { %v634_v60 = vsub.f32 %v629_v50, %v633_v59 }
 0x6b2   :  { %v635_v61 = vmul.f32 1.442695, %v634_v60 }
 0x6b4   :  { %1038 = vpow2.f32 %v635_v61 }
 0x6b7   :  { %v509_v62 = vpop.xlane.xlu2 %508 }
 0x6b8   :  { %1040 = vrcp.f32 %v509_v62 }
 0x6b9   :  { %1042 = vrcp.f32 %v574_v52  ;;  %v849_v52 = vld [vmem:[#allocation10 + $0x18] sm:$0xff] }
 0x6ba   :  { %v1039_v14 = vpop.eup %1038 }
 0x6bb   :  { %v637_v15 = vsel %vm196_vm5, %v1039_v14, 0.0 }
 0x6bc   :  { %638 = vadd.xlane.f32.xlu2 %v637_v15  ;;  %v840_v15 = vperm.slane %v1307_v28, 4 }
 0x6be   :  { %v1041_v18 = vpop.eup %1040 }
 0x6bf   :  { %v511_v51 = vmul.f32 %v1041_v18, %v1037_v54  ;;  %v847_v54 = vld [vmem:[#allocation10 + $0x8] sm:$0xff] }
 0x6c1   :  { %963 = vmatmul.msk.f32.vlgmr.msrb.gmra.mxu0 %vm196_vm5, %v511_v51 }
 0x6c2   :  { %869 = vmatpush.msrb.mxu0 %v849_v52 }
 0x6c4   :  { %870 = vmatpush.msrb.mxu0 %v848_v53 }
 0x6c6   :  { %871 = vmatpush.msrb.mxu0 %v847_v54 }
 0x6c8   :  { %872 = vmatpush.msrb.mxu0 %v846_v55 }
 0x6d4   :  { %577 = vrot.lane.b32.xlu2 %v1375_v30, %s1217_s20  ;;  %v1043_v30 = vpop.eup %1042 }
 0x6d5   :  { %v576_v49 = vmul.f32 %v1043_v30, %v1428_v35  ;;  %v890_v30 = vld [vmem:[#allocation10 + $0x60] sm:$0xff] }
 0x6dc   :  { %463 = vrot.lane.b32.xlu2 %v451_v16, %s1225_s28  ;;  %v843_v16 = vperm.slane %v1307_v28, 5 }
 0x72f   :  { %v639_v5 = vpop.xlane.xlu2 %638 }
 0x730   :  { %1044 = vrcp.f32 %v639_v5  ;;  %v892_v5 = vld [vmem:[#allocation10 + $0x70] sm:$0xff] }
 0x731   :  { %1046 = vrcp.f32 %v704_v58 }
 0x736   :  { %v1045_v7 = vpop.eup %1044 }
 0x737   :  { %v641_v9 = vmul.f32 %v1045_v7, %v1039_v14  ;;  %v578_v10 = vpop.permute.xlu2 %577  ;;  %v1047_v11 = vpop.eup %1046  ;;  %v889_v7 = vld [vmem:[#allocation10 + $0x58] sm:$0xff] }
 0x738   :  { %598 = vmatpush.msrb.mxu1 %v578_v10  ;;  %v706_v20 = vmul.f32 %v1047_v11, %v1438_v44  ;;  %v886_v10 = vld [vmem:[#allocation10 + $0x40] sm:$0xff]  ;;  %v885_v11 = vld [vmem:[#allocation10 + $0x38] sm:$0xff] }
 0x739   :  { %966 = vmatmul.msk.f32.vlgmr.msrb.gmra.mxu1 %vm196_vm5, %v576_v49  ;;  %969 = vmatmul.msk.f32.vlgmr.msra.gmra.mxu0 %vm196_vm5, %v641_v9  ;;  %v888_v49 = vld [vmem:[#allocation10 + $0x50] sm:$0xff]  ;;  %v887_v9 = vld [vmem:[#allocation10 + $0x48] sm:$0xff] }
 0x73a   :  { %728 = vmatpush.msra.mxu1 %v708_v4  ;;  %v893_v4 = vld [vmem:[#allocation10 + $0x78] sm:$0xff] }
 0x73b   :  { %903 = vmatpush.msra.mxu2 %v893_v4 }
 0x73d   :  { %904 = vmatpush.msra.mxu2 %v892_v5 }
 0x73e   :  { %v535_v23 = vpop.f32.mrf.mxu0 }
 0x73f   :  { %v464_v21 = vpop.permute.xlu2 %463  ;;  %905 = vmatpush.msra.mxu2 %v891_v6 }
 0x740   :  { %v470_v22 = vsel %vm469_vm10, %v468_v13, %v464_v21 }
 0x741   :  { %972 = vmatmul.msk.f32.vlgmr.msra.gmra.mxu1 %vm196_vm5, %v706_v20  ;;  %973 = vmatmul.msk.f32.vlgmr.msrb.gmra.mxu3 %vm99_vm0, %v470_v22  ;;  %v884_v22 = vld [vmem:[#allocation10 + $0x30] sm:$0xff] }
 0x742   :  { %906 = vmatpush.msra.mxu2 %v890_v30 }
 0x744   :  { %907 = vmatpush.msra.mxu2 %v889_v7 }
 0x746   :  { %908 = vmatpush.msra.mxu2 %v888_v49 }
 0x748   :  { %909 = vmatpush.msra.mxu2 %v887_v9 }
 0x74a   :  { %910 = vmatpush.msra.mxu2 %v886_v10 }
 0x74c   :  { %911 = vmatpush.msra.mxu2 %v885_v11 }
 0x74e   :  { %912 = vmatpush.msra.mxu2 %v884_v22 }
 0x7b6   :  { %v600_v24 = vpop.f32.mrf.mxu1  ;;  %v665_v25 = vpop.f32.mrf.mxu0 }
 0x7b7   :  { %734 = vrot.lane.b32.xlu1 %v600_v24, %s1207_s6  ;;  %738 = vrot.lane.b32.xlu0 %v665_v25, %s1223_s26  ;;  %v882_v24 = vld [vmem:[#allocation10 + $0x20] sm:$0xff]  ;;  %v850_v25 = vperm.slane %v1307_v28, 6 }
 0x7be   :  { %v730_v26 = vpop.f32.mrf.mxu1 }
 0x7bf   :  { %742 = vrot.lane.b32.xlu2 %v730_v26, %s1225_s28 }
 0x7c4   :  { %v788_v27 = vpop.f32.mrf.mxu3 }
 0x7c5   :  { %v789_v29 = vadd.f32 %v788_v27, %v748_v41 }
 0x7c7   :  { %v1471_v31 = vadd.f32 %v789_v29, %v1281_v0 }
 0x7c9   :  { %v796_v32 = vsel %vm99_vm0, %v1471_v31, 0.0 }
 0x7e1   :  { %797 = vadd.xlane.f32.xlu1 %v796_v32 }
 0x819   :  { %v743_v36 = vpop.permute.xlu2 %742 }
 0x829   :  { %v739_v33 = vpop.permute.xlu0 %738  ;;  %v735_v34 = vpop.permute.xlu1 %734 }
 0x82a   :  { %v745_v35 = vsel %vm196_vm5, %v535_v23, %v735_v34  ;;  %v883_v23 = vld [vmem:[#allocation10 + $0x28] sm:$0xff] }
 0x82b   :  { %v746_v37 = vsel %vm467_vm9, %v745_v35, %v739_v33  ;;  %913 = vmatpush.msra.mxu2 %v883_v23 }
 0x82c   :  { %v747_v39 = vsel %vm469_vm10, %v746_v37, %v743_v36 }
 0x82d   :  { %974 = vmatmul.msk.f32.gmra.mxu3 %vm99_vm0, %v747_v39  ;;  %914 = vmatpush.msra.mxu2 %v882_v24 }
 0x854   :  { %v798_v42 = vpop.xlane.xlu1 %797 }
 0x855   :  { %v802_v43 = vmul.f32 %v798_v42, %v1285_v8 }
 0x857   :  { %v804_v0 = vsub.f32 %v1471_v31, %v802_v43 }
 0x859   :  { %v806_v44 = vmul.f32 %v804_v0, %v804_v0 }
 0x85b   :  { %v808_v45 = vsel %vm99_vm0, %v806_v44, 0.0 }
 0x85c   :  { %809 = vadd.xlane.f32.xlu2 %v808_v45 }
 0x8b0   :  { %v791_v46 = vpop.f32.mrf.mxu3 }
 0x8b1   :  { %v792_v47 = vadd.f32 %v791_v46, %v748_v41 }
 0x8b3   :  { %v1483_v48 = vadd.f32 %v792_v47, %v1334_v40 }
 0x8b5   :  { %v799_v50 = vsel %vm99_vm0, %v1483_v48, 0.0 }
 0x8b6   :  { %800 = vadd.xlane.f32.xlu0 %v799_v50 }
 0x8cf   :  { %v810_v56 = vpop.xlane.xlu2 %809 }
 0x8d0   :  { %v814_v57 = vmul.f32 %v810_v56, %v1285_v8 }
 0x8d2   :  { %v816_v58 = vadd.f32 1e-05, %v814_v57 }
 0x8d4   :  { %1048 = vrsqrt.f32 %v816_v58  ;;  %vm824_vm12 = vweird.f32 %v816_v58 }
 0x8da   :  { %v1049_v59 = vpop.eup %1048 }
 0x8db   :  { %v819_v40 = vmul.f32 %v1049_v59, %v816_v58  ;;  %vm825_vm11 = vweird.f32 %v1049_v59 }
 0x8dc   :  { %vm826_vm13 = vmor %vm824_vm12, %vm825_vm11 }
 0x8dd   :  { %v820_v60 = vmul.f32 %v1049_v59, %v819_v40 }
 0x8df   :  { %v821_v61 = vmul.f32 0.5, %v820_v60 }
 0x8e1   :  { %v822_v62 = vsub.f32 1.5, %v821_v61 }
 0x8e3   :  { %v823_v14 = vmul.f32 %v1049_v59, %v822_v62 }
 0x8e5   :  { %v827_v18 = vsel %vm826_vm13, %v1049_v59, %v823_v14 }
 0x8e6   :  { %v838_v51 = vmul.f32 %v827_v18, %v804_v0 }
 0x8e8   :  { %v841_v17 = vmul.f32 %v840_v15, %v838_v51 }
 0x8ea   :  { %v844_v19 = vadd.f32 %v843_v16, %v841_v17 }
 0x8ec   :  { %975 = vmatmul.msk.f32.vlgmr.msrb.gmra.mxu0 %vm99_vm0, %v844_v19 }
 0x929   :  { %v801_v12 = vpop.xlane.xlu0 %800 }
 0x92a   :  { %v803_v38 = vmul.f32 %v801_v12, %v1285_v8 }
 0x92c   :  { %v805_v13 = vsub.f32 %v1483_v48, %v803_v38 }
 0x92e   :  { %v807_v20 = vmul.f32 %v805_v13, %v805_v13 }
 0x930   :  { %v811_v21 = vsel %vm99_vm0, %v807_v20, 0.0 }
 0x931   :  { %812 = vadd.xlane.f32.xlu1 %v811_v21 }
 0x969   :  { %v874_v26 = vpop.f32.mrf.mxu0 }
 0x96a   :  { %v875_v41 = vadd.f32 %v874_v26, %v850_v25 }
 0x96c   :  { %v880_v27 = vmax.f32 %v875_v41, 0.0 }
 0x96e   :  { %915 = vmatmul.f32.vlgmr.msra.gmra.mxu2 %v880_v27 }
 0x9a4   :  { %v813_v29 = vpop.xlane.xlu1 %812 }
 0x9a5   :  { %v815_v32 = vmul.f32 %v813_v29, %v1285_v8  ;;  %v898_v8 = vperm.slane %v1307_v28, 7 }
 0x9a7   :  { %v817_v33 = vadd.f32 1e-05, %v815_v32 }
 0x9a9   :  { %1050 = vrsqrt.f32 %v817_v33  ;;  %vm834_vm15 = vweird.f32 %v817_v33 }
 0x9af   :  { %v1051_v34 = vpop.eup %1050 }
 0x9b0   :  { %v829_v35 = vmul.f32 %v1051_v34, %v817_v33  ;;  %vm835_vm14 = vweird.f32 %v1051_v34 }
 0x9b1   :  { %vm836_vm1 = vmor %vm834_vm15, %vm835_vm14 }
 0x9b2   :  { %v830_v36 = vmul.f32 %v1051_v34, %v829_v35 }
 0x9b4   :  { %v831_v37 = vmul.f32 0.5, %v830_v36 }
 0x9b6   :  { %v832_v39 = vsub.f32 1.5, %v831_v37 }
 0x9b8   :  { %v833_v42 = vmul.f32 %v1051_v34, %v832_v39 }
 0x9ba   :  { %v837_v43 = vsel %vm836_vm1, %v1051_v34, %v833_v42 }
 0x9bb   :  { %v839_v0 = vmul.f32 %v837_v43, %v805_v13 }
 0x9bd   :  { %v842_v44 = vmul.f32 %v840_v15, %v839_v0 }
 0x9bf   :  { %v845_v45 = vadd.f32 %v843_v16, %v842_v44 }
 0x9c1   :  { %976 = vmatmul.msk.f32.gmra.mxu0 %vm99_vm0, %v845_v45 }
 0x9f1   :  { %v916_v46 = vpop.f32.mrf.mxu2 }
 0x9f2   :  { %v917_v47 = vadd.f32 %v916_v46, %v898_v8 }
 0x9f4   :  { %v922_v50 = vadd.f32 %v917_v47, %v1471_v31 }
 0x9f6   :  { %924 = vst.msk [vmem:[#allocation11] sm:$0xff] %vm99_vm0, %v922_v50 }
 0xa3e   :  { %v877_v52 = vpop.f32.mrf.mxu0 }
 0xa3f   :  { %v878_v53 = vadd.f32 %v877_v52, %v850_v25 }
 0xa41   :  { %v881_v54 = vmax.f32 %v878_v53, 0.0 }
 0xa43   :  { %918 = vmatmul.f32.gmra.mxu2 %v881_v54 }
 0xac6   :  { %v919_v55 = vpop.f32.mrf.mxu2 }
 0xac7   :  { %v920_v56 = vadd.f32 %v919_v55, %v898_v8 }
 0xac9   :  { %v923_v28 = vadd.f32 %v920_v56, %v1483_v48 }
 0xacb   :  { %925 = vst.msk [vmem:[#allocation11 + $0x8] sm:$0xff] %vm99_vm0, %v923_v28 }
 0xacc   :  { %938 = dma.vmem_to_hbm [thread:$0]  %s931_s30, 256, %s933_s9, [#allocation4], %s1206_s1, %s1206_s1, %s1207_s6  }
 0xacd   :  { %1202 = dma.done.wait [#allocation4], 256  }
 0xace   :  { %1203 = vsyncadd [#allocation4], 4294967040 }
 0xacf   :  { %943 = vsyncpa [#allocation3], 1 }
 0xad0   :  { %944 = vsyncpa [#allocation6], 1 }
 0xad1   :  { %945 = vsyncpa [#allocation9], 1 }
 0xad2   :  { %946 = vsyncpa [#allocation4], 1 }

</bundles_post_ra>
